<compile_context>
chip_gen: v7x
topology: tpu7x:2x2x1
jax: 0.10.0
libtpu: 0.0.40
codegen_flags: <defaults>
</compile_context>

<pallas_src>
import functools

import jax
import jax.numpy as jnp
from jax import lax
from jax.experimental import pallas as pl
from jax.experimental.pallas import tpu as pltpu

_LANE = 128
# Max 128-lane chunks per spatial block: bounds the straight-line fold code while still
# giving 2-8 MiB f32 blocks (c_tile = 64..128), which is past the ~1 MiB point where
# measured Pallas pipelines reach ~85%+ of HBM bandwidth.
_MAX_CHUNKS = 64


def _global_max_pool_kernel(x_ref, out_ref, acc_ref, *,
                            n_chunks, n_full_chunks, partial_lanes, multi_block):
    """Running max over the spatial (lane) axis of one (1, c_tile, hw_tile) block.

    Grid = (batch, channel_blocks, spatial_blocks).  The spatial axis (innermost,
    "arbitrary") is the reduction axis: acc_ref persists across it, is reset at k == 0
    and reduced + written to out_ref once at k == last.
    """
    k = pl.program_id(2)
    last = pl.num_programs(2) - 1

    @pl.when(k == 0)
    def _():
        acc_ref[...] = jnp.full(acc_ref.shape, -jnp.inf, dtype=acc_ref.dtype)

    # Chunks that are in-bounds in *every* spatial block (including the last one):
    # fold them unconditionally.  Static 128-lane slices off the ref keep the live set
    # at acc + one chunk (<= 32 vregs); the maxima (VPU) hide under the block DMA.
    if n_full_chunks:
        acc = acc_ref[...]
        for i in range(n_full_chunks):
            acc = jnp.maximum(acc, x_ref[:, :, i * _LANE:(i + 1) * _LANE])
        acc_ref[...] = acc

    if n_full_chunks < n_chunks:
        # Tail-region chunks exist (H*W is not a multiple of hw_tile).
        if multi_block:
            # For every block but the last they are fully valid: plain folds, no mask.
            @pl.when(k != last)
            def _():
                acc = acc_ref[...]
                for i in range(n_full_chunks, n_chunks):
                    acc = jnp.maximum(acc, x_ref[:, :, i * _LANE:(i + 1) * _LANE])
                acc_ref[...] = acc

        if partial_lanes:
            # The single chunk straddling H*W: masked fold, last block only.  Chunks
            # entirely past H*W in the last block are skipped outright, so the mask cost
            # is one 128-lane chunk on one grid step instead of the whole tile every step.
            @pl.when(k == last)
            def _():
                start = n_full_chunks * _LANE
                chunk = x_ref[:, :, start:start + _LANE]
                lane = lax.broadcasted_iota(jnp.int32, chunk.shape, 2)
                chunk = jnp.where(lane < partial_lanes, chunk,
                                  jnp.full_like(chunk, -jnp.inf))
                acc_ref[...] = jnp.maximum(acc_ref[...], chunk)

    @pl.when(k == last)
    def _():
        # Single cross-lane (XLU) reduce per (batch row, channel block).
        pooled = jnp.max(acc_ref[...], axis=-1)               # (1, c_tile)
        out_ref[...] = pooled[:, None, :].astype(out_ref.dtype)


def _vmem_capacity_bytes():
    """Physical VMEM of the local TPU generation (128 MiB v5e/v6e, 64 MiB v7x)."""
    try:
        cap = getattr(pltpu.get_tpu_info(), "vmem_capacity_bytes", None)
        if cap:
            return int(cap)
    except Exception:
        pass
    return 64 * 1024 * 1024  # conservative fallback: assume the smallest generation


def _choose_c_tile(c):
    """Channel tile.  c_tile <= 128 keeps the live accumulator + one streaming chunk
    at <= 32 vregs (half the register file) even at C=512, and gives wide-channel
    models >= 2 "parallel" channel blocks so small-batch runs still feed both v7x
    TensorCores.  Output-block layout requires c_tile % 128 == 0 unless c_tile == C.
    (B == 1 with C <= 128 still yields a single parallel slice -- acceptable for a
    layer this small.)"""
    if c > 128 and c % 128 == 0:
        return 128
    return c


def _choose_hw_tile(c_tile, hw, itemsize, block_budget_bytes):
    """Lane-aligned spatial tile: as large as the per-block VMEM budget and the
    straight-line-code bound allow (2-8 MiB f32 blocks), never more than the
    lane-padded spatial extent."""
    hw_padded = int(pl.cdiv(hw, _LANE)) * _LANE
    by_budget = max(_LANE, (block_budget_bytes // (c_tile * itemsize)) // _LANE * _LANE)
    return int(min(hw_padded, by_budget, _MAX_CHUNKS * _LANE))


def adaptive_max_pool_1(x, *, hw_tile=None, c_tile=None):
    """AdaptiveMaxPool2d(1): global spatial max per (b, c).  Returns (B, C) in x.dtype."""
    B, C, H, W = x.shape
    HW = H * W
    itemsize = jnp.dtype(x.dtype).itemsize

    # Generation-aware VMEM budget: at most ~60% of physical VMEM (capped at 64 MiB)
    # for this kernel, a quarter of that per x block (Pallas double-buffers each input).
    kernel_budget = min(int(_vmem_capacity_bytes() * 0.6), 64 * 1024 * 1024)
    if c_tile is None:
        c_tile = _choose_c_tile(C)
    if hw_tile is None:
        hw_tile = _choose_hw_tile(c_tile, HW, itemsize, kernel_budget // 4)

    n_c = int(pl.cdiv(C, c_tile))
    n_hw = int(pl.cdiv(HW, hw_tile))
    n_chunks = hw_tile // _LANE
    rem = HW % hw_tile
    n_full_chunks = n_chunks if rem == 0 else rem // _LANE
    partial_lanes = 0 if rem == 0 else rem % _LANE

    x_flat = x.reshape(B, C, HW)
    x_block_bytes = c_tile * hw_tile * itemsize
    vmem_limit = int(min(max(4 * x_block_bytes, 16 * 1024 * 1024), kernel_budget))

    kernel = functools.partial(
        _global_max_pool_kernel,
        n_chunks=n_chunks, n_full_chunks=n_full_chunks,
        partial_lanes=partial_lanes, multi_block=(n_hw > 1))

    pooled = pl.pallas_call(
        kernel,
        out_shape=jax.ShapeDtypeStruct((B, 1, C), x.dtype),
        grid_spec=pltpu.PrefetchScalarGridSpec(
            num_scalar_prefetch=0,
            grid=(B, n_c, n_hw),
            in_specs=[pl.BlockSpec((1, c_tile, hw_tile), lambda b, ci, k: (b, ci, k))],
            out_specs=pl.BlockSpec((1, 1, c_tile), lambda b, ci, k: (b, 0, ci)),
            scratch_shapes=[pltpu.VMEM((1, c_tile, _LANE), x.dtype)],
        ),
        compiler_params=pltpu.CompilerParams(
            dimension_semantics=("parallel", "parallel", "arbitrary"),
            vmem_limit_bytes=vmem_limit,
        ),
        cost_estimate=pl.CostEstimate(
            flops=B * C * HW,                      # streaming max-compares
            transcendentals=0,
            bytes_accessed=itemsize * (B * C * HW + B * C),
        ),
    )(x_flat)

    return pooled.reshape(B, C)


def channel_attention_weights(x, w1, b1, w2, b2, *, hw_tile=None, c_tile=None):
    """Per-(b, c) attention weights, shape (B, C) float32."""
    pooled = adaptive_max_pool_1(x, hw_tile=hw_tile, c_tile=c_tile)   # (B, C), x.dtype
    pooled = pooled.astype(jnp.float32)
    # Tiny bottleneck MLP (fc1 -> ReLU -> fc2 -> sigmoid).  Hoisted out of the kernel:
    # it is a single batched XLA matmul over all rows (negligible FLOPs), which removes
    # four double-buffered weight streams and per-row M=1 MXU calls from the pipeline.
    h = jnp.maximum(pooled @ w1 + b1, 0.0)                            # (B, 9)
    return jax.nn.sigmoid(h @ w2 + b2)                                # (B, C)


def channel_attention_net(x, w1, b1, w2, b2, *, hw_tile=None, c_tile=None):
    """Matches Channel_attention_net.forward: attention weights expanded to x's shape."""
    B, C, H, W = x.shape
    attn = channel_attention_weights(x, w1, b1, w2, b2, hw_tile=hw_tile, c_tile=c_tile)
    # expand_as(x): pure broadcast glue.  Downstream code should prefer the compact
    # (B, C) weights to avoid materializing an input-sized tensor in HBM.
    return jnp.broadcast_to(attn[:, :, None, None], (B, C, H, W))


def _reference(x, w1, b1, w2, b2):
    pooled = jnp.max(x, axis=(2, 3)).astype(jnp.float32)              # (B, C)
    h = jnp.maximum(pooled @ w1 + b1, 0.0)
    o = jax.nn.sigmoid(h @ w2 + b2)
    return jnp.broadcast_to(o[:, :, None, None], x.shape).astype(jnp.float32)


if __name__ == "__main__":
    HID = 9  # hidden width fixed by nn.Linear(channel, 9)
    key = jax.random.PRNGKey(0)

    # Overrides force the multi-block / ragged-tail / channel-tiled code paths at small
    # test shapes (default sizing would put each of these in a single block).
    cases = [
        ((2, 64, 16, 16), jnp.float32, {}),                         # single block, no tail
        ((2, 64, 48, 48), jnp.float32, {}),                         # single bigger block
        ((2, 64, 35, 33), jnp.float32, dict(hw_tile=512)),          # 3 spatial blocks, ragged tail
        ((1, 256, 20, 20), jnp.bfloat16, dict(hw_tile=256)),        # bf16 stream, 2 channel blocks
    ]

    for (B, C, H, W), dtype, overrides in cases:
        key, kx, k1, k2, k3, k4 = jax.random.split(key, 6)
        x = jax.random.normal(kx, (B, C, H, W), dtype=jnp.float32).astype(dtype)

        # Deterministic PyTorch-Linear-style init (uniform in +/- 1/sqrt(fan_in)).
        lim1 = 1.0 / jnp.sqrt(jnp.float32(C))
        lim2 = 1.0 / jnp.sqrt(jnp.float32(HID))
        w1 = jax.random.uniform(k1, (C, HID), jnp.float32, -lim1, lim1)   # fc1 (in x out)
        b1 = jax.random.uniform(k2, (HID,), jnp.float32, -lim1, lim1)
        w2 = jax.random.uniform(k3, (HID, C), jnp.float32, -lim2, lim2)   # fc2 (in x out)
        b2 = jax.random.uniform(k4, (C,), jnp.float32, -lim2, lim2)

        out = jax.block_until_ready(channel_attention_net(x, w1, b1, w2, b2, **overrides))
        ref = jax.block_until_ready(_reference(x, w1, b1, w2, b2))

        assert out.shape == (B, C, H, W)
        assert jnp.allclose(out, ref, atol=1e-5, rtol=1e-5), \
            f"mismatch vs JAX reference for shape {(B, C, H, W)} dtype {dtype}"

    print("KERNEL_OK")
</pallas_src>

<mosaic_0001>
module attributes {stable_mosaic.version = 11 : i64} {
  func.func @_global_max_pool_kernel(%arg0: i32, %arg1: i32, %arg2: i32, %arg3: memref<1x64x256xf32, #tpu.memory_space<vmem>>, %arg4: memref<1x1x64xf32, #tpu.memory_space<vmem>>, %arg5: memref<1x64x128xf32, #tpu.memory_space<vmem>>) attributes {dimension_semantics = [#tpu.dimension_semantics<parallel>, #tpu.dimension_semantics<parallel>, #tpu.dimension_semantics<arbitrary>], iteration_bounds = array<i64: 2, 1, 1>, scalar_prefetch = 0 : i64, scratch_operands = 1 : i64, tpu.core_type = #tpu.core_type<tc>, window_params = [{transform_indices = @transform_0, window_bounds = array<i64: 1, 64, 256>}, {transform_indices = @transform_1, window_bounds = array<i64: 1, 1, 64>}]} {
    %c0_i32 = arith.constant 0 : i32
    %0 = arith.cmpi eq, %arg2, %c0_i32 : i32
    %1 = arith.extui %0 : i1 to i32
    %c0_i32_0 = arith.constant 0 : i32
    %2 = arith.cmpi ne, %1, %c0_i32_0 : i32
    scf.if %2 {
      %cst = arith.constant 0xFF800000 : f32
      %12 = vector.broadcast %cst : f32 to vector<1x64x128xf32>
      %c0_13 = arith.constant 0 : index
      %c0_14 = arith.constant 0 : index
      %c0_15 = arith.constant 0 : index
      %13 = vector.load %arg5[%c0_13, %c0_14, %c0_15] : memref<1x64x128xf32, #tpu.memory_space<vmem>>, vector<1x64x128xf32>
      tpu.vector_store %arg5[%c0_13, %c0_14, %c0_15], %12 {strides = array<i32>} : memref<1x64x128xf32, #tpu.memory_space<vmem>>, vector<1x64x128xf32>,
    } else {
    }
    %c0 = arith.constant 0 : index
    %c0_1 = arith.constant 0 : index
    %c0_2 = arith.constant 0 : index
    %3 = vector.load %arg5[%c0, %c0_1, %c0_2] : memref<1x64x128xf32, #tpu.memory_space<vmem>>, vector<1x64x128xf32>
    %c0_3 = arith.constant 0 : index
    %c0_4 = arith.constant 0 : index
    %c0_5 = arith.constant 0 : index
    %4 = vector.load %arg3[%c0_3, %c0_4, %c0_5] : memref<1x64x256xf32, #tpu.memory_space<vmem>>, vector<1x64x128xf32>
    %5 = arith.maximumf %3, %4 : vector<1x64x128xf32>
    %c0_6 = arith.constant 0 : index
    %c0_7 = arith.constant 0 : index
    %c128 = arith.constant 128 : index
    %6 = vector.load %arg3[%c0_6, %c0_7, %c128] : memref<1x64x256xf32, #tpu.memory_space<vmem>>, vector<1x64x128xf32>
    %7 = arith.maximumf %5, %6 : vector<1x64x128xf32>
    %c0_8 = arith.constant 0 : index
    %c0_9 = arith.constant 0 : index
    %c0_10 = arith.constant 0 : index
    %8 = vector.load %arg5[%c0_8, %c0_9, %c0_10] : memref<1x64x128xf32, #tpu.memory_space<vmem>>, vector<1x64x128xf32>
    tpu.vector_store %arg5[%c0_8, %c0_9, %c0_10], %7 {strides = array<i32>} : memref<1x64x128xf32, #tpu.memory_space<vmem>>, vector<1x64x128xf32>,
    %c0_i32_11 = arith.constant 0 : i32
    %9 = arith.cmpi eq, %arg2, %c0_i32_11 : i32
    %10 = arith.extui %9 : i1 to i32
    %c0_i32_12 = arith.constant 0 : i32
    %11 = arith.cmpi ne, %10, %c0_i32_12 : i32
    scf.if %11 {
      %c0_13 = arith.constant 0 : index
      %c0_14 = arith.constant 0 : index
      %c0_15 = arith.constant 0 : index
      %12 = vector.load %arg5[%c0_13, %c0_14, %c0_15] : memref<1x64x128xf32, #tpu.memory_space<vmem>>, vector<1x64x128xf32>
      %cst = arith.constant dense<0xFF800000> : vector<1x64xf32>
      %13 = vector.multi_reduction <maximumf>, %12, %cst [2] : vector<1x64x128xf32> to vector<1x64xf32>
      %14 = vector.shape_cast %13 : vector<1x64xf32> to vector<1x1x64xf32>
      %c0_16 = arith.constant 0 : index
      %c0_17 = arith.constant 0 : index
      %c0_18 = arith.constant 0 : index
      %15 = vector.load %arg4[%c0_16, %c0_17, %c0_18] : memref<1x1x64xf32, #tpu.memory_space<vmem>>, vector<1x1x64xf32>
      tpu.vector_store %arg4[%c0_16, %c0_17, %c0_18], %14 {strides = array<i32>} : memref<1x1x64xf32, #tpu.memory_space<vmem>>, vector<1x1x64xf32>,
    } else {
    }
    return
  }
  func.func @transform_0(%arg0: i32, %arg1: i32, %arg2: i32) -> (i32, i32, i32) {
    %c0_i32 = arith.constant 0 : i32
    return %arg0, %arg1, %arg2 : i32, i32, i32
  }
  func.func @transform_1(%arg0: i32, %arg1: i32, %arg2: i32) -> (i32, i32, i32) {
    %c0_i32 = arith.constant 0 : i32
    %c0_i32_0 = arith.constant 0 : i32
    return %arg0, %c0_i32, %arg1 : i32, i32, i32
  }
}

</mosaic_0001>

<bundles_post_ra>
// kernel: tpu_custom_call.1
= control target key start
LH: loop header
LB: loop body
LE: loop exit
PB: predicated region body
PF: predicated region fallthrough
CT: control target
= control target key end

     0   :  { %6 = vsyncpa [#allocation4], 0  ;;  %s795_s0 = inlined_call_operand.hbm [shape: f32[2,64,256], index: 0, kind: input, shape index: {}]   ;;  %s796_s1 = inlined_call_operand.hbm [shape: f32[2,1,64], index: 1, kind: output, shape index: {}]  }
   0x1   :  { %8 = vsyncpa [#allocation4 + $0x1], 0 }
   0x2   :  { %9 = vsyncpa [#allocation5], 0 }
   0x3   :  { %11 = vsyncpa [#allocation5 + $0x1], 0  ;;  %s621_s6 = smov 0   ;;  %s623_s7 = smov 0  }
   0x4   :  { %s625_s8 = smov 0   ;;  %s627_s9 = smov 0  }
   0x5   :  { %s629_s10 = smov 0   ;;  %s631_s11 = smov 0  }
   0x6 LB: > { %s416_s12 = sadd.s32 4294967295, %s605_s11   ;;  %s417_s13 = sadd.s32 4294967294, %s605_s11   ;;  %s605_s11 = sphi %s631_s11, %s17_s11   ;;  %s601_s10 = sphi %s629_s10, %s811_s10   ;;  %s597_s9 = sphi %s627_s9, %s810_s9   ;;  %s593_s8 = sphi %s625_s8, %s809_s8   ;;  %s589_s7 = sphi %s623_s7, %s808_s7   ;;  %s585_s6 = sphi %s621_s6, %s807_s6  }
   0x7   : > { %s36_s14 = sadd.s32 1, %s601_s10  ;;  %s47_s15 = sadd.s32 1, %s593_s8 }
   0x8   : > { %p38_p0 = scmp.ge.s32.totalorder %s36_s14, 2  ;;  %p54_p1 = scmp.ne.s32.totalorder %s593_s8, %s589_s7 }
   0x9   : > { %p55_p2 = scmp.eq.s32.totalorder %s605_s11, 0  ;;  %p60_p3 = scmp.ne.s32.totalorder %s589_s7, %s585_s6 }
   0xa   : > { %s813_s14 = smov (%p38_p0, %s36_s14), 0  ;;  %p61_p5 = scmp.eq.s32.totalorder %s416_s12, 0 }
   0xb   : > { %p662_p4 = por %p55_p2, %p54_p1  ;;  %s40_s17 = ssub.s32 %s601_s10, %s813_s14 }
   0xc   : > { %p86_p6 = scmp.eq.s32.totalorder %s416_s12, 1  ;;  %p45_p7 = scmp.eq.s32.totalorder %s40_s17, 0 }
   0xd   : > { %p668_p8 = por %p61_p5, %p60_p3  ;;  %p92_p10 = scmp.eq.s32.totalorder %s417_s13, 1 }
   0xe   : > { %p672_p9 = por %p86_p6, %p54_p1  ;;  %p441_p13 = scmp.lt.s32.totalorder %s605_s11, 2 }
   0xf   : > { %s677_s20 = scalar_select %p45_p7, %s593_s8, %s47_s15  }
  0x10   : > { %s800_s19 = scalar_select %p672_p9, 1, 0 }
  0x11   : > { %p679_p11 = por %p92_p10, %p60_p3  ;;  %s112_s22 = sand.u32 1, %s593_s8  }
  0x12   : > { %s420_s23 = sshll.u32 %s112_s22, 7  ;;  %s428_s24 = sshll.u32 %s601_s10, 11 }
  0x13   : > { %s801_s21 = scalar_select %p679_p11, 1, 0 }
  0x14   : > { %s690_s27 = scalar_lea.hbm %s795_s0, %s428_s24  ;;  %s116_s28 = scalar_lea.vmem [#allocation3], %s420_s23 }
  0x15   : > { %s128_s29 = sshll.u32 %s116_s28, 4  ;;  %p696_p0 = pnand %p441_p13, %p662_p4  ;;  %s692_s29 = int_to_ptr.vmem [resolvable:$true] %s128_s29 }
  0x16   : > { %s701_s2 = scalar_lea.sflag [#allocation4], %s112_s22  ;;  %s493_s3 = scalar_lea.hbm %s690_s27, 2048 }
  0x17   : > { %p494_p2 = scmp.ne.s32.totalorder %s690_s27, %s493_s3  ;;  %p495_p3 = pneg %p696_p0 }
  0x18   : > { %s498_s12 = scalar_lea.hbm %s795_s0, 4096  ;;  %p499_p4 = scmp.lt.u32.totalorder %s690_s27, %s795_s0 }
  0x19   : > { %p496_p5 = pnand %p495_p3, %p494_p2  ;;  %p500_p7 = scmp.lt.u32.totalorder %s498_s12, %s493_s3 }
  0x1a   : > { %p502_p13 = scmp.lt.u32.totalorder %s493_s3, %s690_s27 }
  0x1b   : > { %p497_p6 = pneg %p496_p5  ;;  %p501_p10 = por %p500_p7, %p499_p4 }
  0x1d   : > { %p503_p12 = por %p502_p13, %p501_p10 }
  0x1f   : > { %p504_p1 = pnand %p503_p12, %p497_p6 }
  0x21   : > { %507 = shalt.err (!%p504_p1)
}
  0x22   : > { %s508_s16 = scalar_lea.vmem %s692_s29, 2048  ;;  %s607_s17 = smov [#allocation3]  }
  0x23   : > { %p509_p2 = scmp.ne.s32.totalorder %s692_s29, %s508_s16  ;;  %s513_s22 = sshll.u32 %s607_s17, 4  ;;  %s514_s22 = int_to_ptr.vmem [resolvable:$false] %s513_s22 }
  0x24   : > { %s515_s23 = scalar_lea.vmem %s514_s22, 4096  ;;  %p516_p9 = scmp.lt.s32.totalorder %s692_s29, %s514_s22 }
  0x25   : > { %p511_p5 = pnand %p509_p2, %p495_p3  ;;  %p517_p4 = scmp.lt.s32.totalorder %s515_s23, %s508_s16 }
  0x27   : > { %p512_p11 = pneg %p511_p5  ;;  %p518_p7 = por %p517_p4, %p516_p9 }
  0x29   : > { %p519_p10 = pnand %p518_p7, %p512_p11 }
  0x2b   : > { %522 = shalt.err (!%p519_p10)
}
  0x2c   : > { %s608_s24 = smov 256   ;;  %s609_s25 = smov 16  }
  0x2d   : > { %436 = dma.hbm_to_vmem [thread:$0]  (!%p696_p0), %s690_s27, 2048, %s692_s29, %s701_s2, %s608_s24, %s608_s24, %s609_s25  }
  0x2e   : > { %p136_p12 = scmp.lt.s32.totalorder %s605_s11, 3  ;;  %p803_p1 = scmp.ge.s32.totalorder %s605_s11, 1 }
  0x30   : > { %p137_p3 = pnand %p803_p1, %p136_p12 }
  0x31   : > { %s733_s26 = sand.u32 (!%p137_p3), 1, %s589_s7  }
  0x32   : > { %140 = sbr.rel (%p137_p3) target bundleno = 233 (0xe9), region = 24  ;;  %s424_s28 = sshll.u32 (!%p137_p3), %s733_s26, 7 }
  0x33   : > { %s143_s3 = scalar_lea.sflag (!%p137_p3), [#allocation4], %s733_s26  ;;  %s146_s4 = scalar_lea.vmem (!%p137_p3), [#allocation3], %s424_s28 }
  0x39   : > { %576 = dma.done.wait (%p668_p8), %s143_s3, 2048  }
  0x3a   : > { %578 = vsyncadd (%p668_p8), %s143_s3, 4294965248  ;;  %v186_v0 = vld [vmem:[%s146_s4] sm:$0xff]  ;;  %v202_v1 = vld [vmem:[%s146_s4 + $0x8] sm:$0xff]  ;;  %v261_v24 = vlaneseq  ;;  %vm272_vm0 = vcmask 130112   ;;  %vm279_vm1 = vcmask 195712   ;;  %vm286_vm2 = vcmask 261312  }
  0x3b   : > { %v188_v2 = vld [vmem:[%s146_s4 + $0x20] sm:$0xff]  ;;  %v210_v3 = vmax.f32 %v186_v0, %v202_v1  ;;  %v204_v4 = vld [vmem:[%s146_s4 + $0x28] sm:$0xff]  ;;  %v187_v5 = vld [vmem:[%s146_s4 + $0x10] sm:$0xff]  ;;  %vm293_vm3 = vcmask 326912   ;;  %vm300_vm4 = vcmask 392512   ;;  %vm307_vm5 = vcmask 458112  }
  0x3c   : > { %v203_v6 = vld [vmem:[%s146_s4 + $0x18] sm:$0xff]  ;;  %v212_v7 = vmax.f32 %v188_v2, %v204_v4  ;;  %v189_v8 = vld [vmem:[%s146_s4 + $0x30] sm:$0xff]  ;;  %v190_v12 = vld [vmem:[%s146_s4 + $0x40] sm:$0xff]  ;;  %v262_v25 = vand.u32 127, %v261_v24  ;;  %v264_v26 = vshrl.u32 %v261_v24, 7  ;;  %s425_s18 = sshll.u32 %s597_s9, 4 }
  0x3d   : > { %v205_v9 = vld [vmem:[%s146_s4 + $0x38] sm:$0xff]  ;;  %237 = vmax.xlane.f32.xlu0 %v210_v3  ;;  %v211_v10 = vmax.f32 %v187_v5, %v203_v6  ;;  %v206_v13 = vld [vmem:[%s146_s4 + $0x48] sm:$0xff]  ;;  %v191_v14 = vld [vmem:[%s146_s4 + $0x50] sm:$0xff]  ;;  %s163_s27 = scalar_lea.vmem [#allocation6], %s733_s26  ;;  %vm314_vm6 = vcmask 523712   ;;  %vm317_vm7 = vcmask 516096   ;;  %s746_s5 = scalar_lea.hbm %s796_s1, %s425_s18 }
  0x3e   : > { %241 = vmax.xlane.f32.xlu1 %v212_v7  ;;  %v213_v11 = vmax.f32 %v189_v8, %v205_v9  ;;  %v207_v15 = vld [vmem:[%s146_s4 + $0x58] sm:$0xff]  ;;  %v214_v16 = vmax.f32 %v190_v12, %v206_v13  ;;  %v192_v18 = vld [vmem:[%s146_s4 + $0x60] sm:$0xff]  ;;  %v208_v19 = vld [vmem:[%s146_s4 + $0x68] sm:$0xff]  ;;  %v267_v27 = vadd.s32 4294967288, %v262_v25  ;;  %v274_v28 = vadd.s32 4294967280, %v262_v25  ;;  %s333_s29 = sshll.u32 %s163_s27, 4  ;;  %s748_s29 = int_to_ptr.vmem [resolvable:$true] %s333_s29 }
  0x3f   : > { %v215_v17 = vmax.f32 %v191_v14, %v207_v15  ;;  %v193_v20 = vld [vmem:[%s146_s4 + $0x70] sm:$0xff]  ;;  %v209_v21 = vld [vmem:[%s146_s4 + $0x78] sm:$0xff]  ;;  %v216_v22 = vmax.f32 %v192_v18, %v208_v19  ;;  %v281_v29 = vadd.s32 4294967272, %v262_v25  ;;  %v265_v31 = vsub.s32 %v262_v25, %v264_v26  ;;  %s320_s9 = scalar_lea.sflag [#allocation5], %s733_s26  ;;  %s523_s12 = scalar_lea.vmem %s748_s29, 16 }
  0x40   : > { %v217_v23 = vmax.f32 %v193_v20, %v209_v21  ;;  %v270_v33 = vsub.s32 %v267_v27, %v264_v26  ;;  %v288_v34 = vadd.s32 4294967264, %v262_v25  ;;  %v277_v35 = vsub.s32 %v274_v28, %v264_v26  ;;  %p524_p8 = scmp.ne.s32.totalorder %s748_s29, %s523_s12  ;;  %p804_p9 = scmp.ne.s32.totalorder %s800_s19, 0 }
  0x41   : > { %239 = vmax.xlane.f32.xlu0 %v211_v10  ;;  %v284_v36 = vsub.s32 %v281_v29, %v264_v26  ;;  %v295_v37 = vadd.s32 4294967256, %v262_v25  ;;  %v302_v43 = vadd.s32 4294967248, %v262_v25  ;;  %v309_v47 = vadd.s32 4294967240, %v262_v25  ;;  %s610_s13 = smov [#allocation6]  }
  0x42   : > { %243 = vmax.xlane.f32.xlu1 %v213_v11  ;;  %v291_v42 = vsub.s32 %v288_v34, %v264_v26  ;;  %p525_p11 = pnand %p524_p8, %p804_p9  ;;  %s527_s15 = sshll.u32 %s610_s13, 4  ;;  %s528_s15 = int_to_ptr.vmem [resolvable:$false] %s527_s15 }
  0x43   : > { %v298_v46 = vsub.s32 %v295_v37, %v264_v26  ;;  %v305_v54 = vsub.s32 %v302_v43, %v264_v26  ;;  %v312_v56 = vsub.s32 %v309_v47, %v264_v26  ;;  %s529_s16 = scalar_lea.vmem %s528_s15, 32  ;;  %p530_p6 = scmp.lt.s32.totalorder %s748_s29, %s528_s15 }
  0x44   : > { %p526_p0 = pneg %p525_p11  ;;  %p531_p13 = scmp.lt.s32.totalorder %s529_s16, %s523_s12 }
  0x45   : > { %245 = vmax.xlane.f32.xlu0 %v214_v16 }
  0x46   : > { %247 = vmax.xlane.f32.xlu1 %v215_v17  ;;  %p532_p2 = por %p531_p13, %p530_p6 }
  0x48   : > { %p533_p5 = pnand %p532_p2, %p526_p0 }
  0x49   : > { %249 = vmax.xlane.f32.xlu0 %v216_v22 }
  0x4a   : > { %251 = vmax.xlane.f32.xlu1 %v217_v23 }
  0xca   : > { %v238_v30 = vpop.xlane.xlu0 %237 }
  0xcb   : > { %v242_v32 = vpop.xlane.xlu1 %241  ;;  %v266_v39 = vrot.slane %v238_v30, %v265_v31 }
  0xcc   : > { %v278_v44 = vrot.slane %v242_v32, %v277_v35 }
  0xce   : > { %v240_v38 = vpop.xlane.xlu0 %239 }
  0xcf   : > { %v271_v40 = vrot.slane %v240_v38, %v270_v33  ;;  %v244_v41 = vpop.xlane.xlu1 %243 }
  0xd0   : > { %v285_v45 = vrot.slane %v244_v41, %v284_v36 }
  0xd1   : > { %v273_v48 = vsel %vm272_vm0, %v271_v40, %v266_v39 }
  0xd2   : > { %v280_v49 = vsel %vm279_vm1, %v278_v44, %v273_v48  ;;  %v246_v50 = vpop.xlane.xlu0 %245 }
  0xd3   : > { %v287_v51 = vsel %vm286_vm2, %v285_v45, %v280_v49  ;;  %v292_v52 = vrot.slane %v246_v50, %v291_v42  ;;  %v248_v53 = vpop.xlane.xlu1 %247 }
  0xd4   : > { %v299_v55 = vrot.slane %v248_v53, %v298_v46 }
  0xd5   : > { %v294_v57 = vsel %vm293_vm3, %v292_v52, %v287_v51 }
  0xd6   : > { %v250_v58 = vpop.xlane.xlu0 %249  ;;  %v301_v61 = vsel %vm300_vm4, %v299_v55, %v294_v57 }
  0xd7   : > { %v306_v59 = vrot.slane %v250_v58, %v305_v54  ;;  %v252_v60 = vpop.xlane.xlu1 %251 }
  0xd8   : > { %v313_v62 = vrot.slane %v252_v60, %v312_v56 }
  0xd9   : > { %v308_v63 = vsel %vm307_vm5, %v306_v59, %v301_v61 }
  0xda   : > { %v315_v0 = vsel %vm314_vm6, %v313_v62, %v308_v63 }
  0xdb   : > { %318 = vst.msk [vmem:[%s163_s27] sm:$0x1] %vm317_vm7, %v315_v0 }
  0xdc   : > { %536 = shalt.err (!%p533_p5)
}
  0xdd   : > { %s537_s17 = scalar_lea.hbm %s746_s5, 16  ;;  %s541_s24 = scalar_lea.hbm %s796_s1, 32 }
  0xde   : > { %p538_p4 = scmp.ne.s32.totalorder %s746_s5, %s537_s17  ;;  %p542_p12 = scmp.lt.u32.totalorder %s746_s5, %s796_s1 }
  0xdf   : > { %p543_p1 = scmp.lt.u32.totalorder %s541_s24, %s537_s17  ;;  %p545_p8 = scmp.lt.u32.totalorder %s537_s17, %s746_s5 }
  0xe0   : > { %p539_p7 = pnand %p538_p4, %p804_p9 }
  0xe1   : > { %p544_p3 = por %p543_p1, %p542_p12 }
  0xe2   : > { %p540_p10 = pneg %p539_p7 }
  0xe3   : > { %p546_p11 = por %p545_p8, %p544_p3 }
  0xe5   : > { %p547_p0 = pnand %p546_p11, %p540_p10 }
  0xe7   : > { %550 = shalt.err (!%p547_p0)
}
  0xe8   : > { %431 = dma.vmem_to_hbm [thread:$0]  (%p804_p9), %s748_s29, 16, %s746_s5, %s320_s9  }
  0xe9 PF: > { %s345_s28 = sand.u32 1, %s585_s6   ;;  %p805_p6 = scmp.ne.s32.totalorder %s801_s21, 0 }
  0xea   : > { %p806_p13 = scmp.ge.s32.totalorder %s605_s11, 2  ;;  %s346_s3 = scalar_lea.sflag [#allocation5], %s345_s28 }
  0xec   : > { %p438_p2 = pnand %p806_p13, %p805_p6 }
  0xee   : > { %580 = dma.done.wait (!%p438_p2), %s346_s3, 16  }
  0xef   : > { %582 = vsyncadd (!%p438_p2), %s346_s3, 4294967280  ;;  %s17_s11 = sadd.s32 1, %s605_s11   ;;  %s807_s6 = smov %s589_s7 }
  0xf0   : > { %p14_p5 = scmp.ge.s32.totalorder %s17_s11, 4   ;;  %s808_s7 = smov %s593_s8 }
  0xf1   : > { %s809_s8 = smov %s677_s20  ;;  %s810_s9 = smov %s601_s10 }
  0xf2   : > { %s811_s10 = smov %s813_s14  ;;  %16 = sbr.rel (!%p14_p5) target bundleno = 6 (0x6), region = 77 }
  0xf9   :  { %350 = vsyncpa [#allocation4], 1 }
  0xfa   :  { %352 = vsyncpa [#allocation4 + $0x1], 1 }
  0xfb   :  { %353 = vsyncpa [#allocation5], 1 }
  0xfc   :  { %355 = vsyncpa [#allocation5 + $0x1], 1 }

</bundles_post_ra>
